<compile_context>
chip_gen: v5e
topology: v5e:2x2
jax: 0.10.0
libtpu: 0.0.40
codegen_flags: <defaults>
</compile_context>

<pallas_src>
import jax
import jax.numpy as jnp
from jax.experimental import pallas as pl
from jax.experimental.pallas import tpu as pltpu

# Parity-decomposition tables for ConvTranspose2d(2,2,s=2) -> pad(1) -> Conv2d(3x3):
# output row 2i+p, conv tap ky reads ConvTranspose parity plane di[p][ky] at padded-input
# row i + l0[p][ky].  Columns use the same tables (q, kx, dj, m0) by symmetry.
_L0 = ((0, 1, 1), (1, 1, 2))   # l0[p][ky]
_DI = ((1, 0, 1), (0, 1, 0))   # di[p][ky]


def _upsample_block_kernel(patch_ref, w_ref, bias_ref, o_ref):
    # patch_ref: (1, 9C, HW)  im2col of the padded small input, pixels in lanes
    # w_ref:     (4C, 9C)     composed per-parity 3x3 weights
    # bias_ref:  (4C, HW)     exact bias map (f32)
    # o_ref:     (1, 4C, HW)  output, pixels in lanes (lane-dense store)
    acc = jnp.dot(w_ref[...], patch_ref[0], preferred_element_type=jnp.float32)
    o_ref[0] = (acc + bias_ref[...]).astype(o_ref.dtype)


def _compose(w_up, b_up, w_conv, b_conv, H, W, dtype):
    """Fold ConvTranspose2d(2,2,s=2) + Conv2d(3x3) into per-parity 3x3 weights + bias map."""
    C = w_up.shape[0]
    hi = jax.lax.Precision.HIGHEST
    di = jnp.array(_DI)                                           # (2, 3)
    # sel[d,c,p,q,ky,kx] = w_up[d, c, di[p,ky], di[q,kx]]   (d = ConvTranspose input channel)
    sel = w_up[:, :, di[:, None, :, None], di[None, :, None, :]]  # (C, C, 2, 2, 3, 3)
    # A[p,q,o,d,ky,kx] = sum_c w_conv[o,c,ky,kx] * sel[d,c,p,q,ky,kx]
    A = jnp.einsum('ocyx,dcpqyx->pqodyx', w_conv, sel, precision=hi)
    # merge taps that read the same padded-input offset (r, s) = (l0[p,ky], m0[q,kx])
    oh = jax.nn.one_hot(jnp.array(_L0), 3, dtype=w_conv.dtype)    # (2, 3, 3): [p, ky, r]
    A3 = jnp.einsum('pqodyx,pyr,qxs->pqodrs', A, oh, oh, precision=hi)
    w_big = jnp.transpose(A3, (0, 1, 2, 4, 5, 3)).reshape(4 * C, 9 * C).astype(dtype)

    # Bias: b_conv + sum over *valid* taps of (sum_{kx,c} w_conv[o,c,ky,kx] * b_up[c]).
    # The zero H-pad rows of the upsampled image carry no ConvTranspose bias, which only
    # affects output rows 0 (p=0, ky=0) and 2H-1 (p=1, ky=2).
    g = jnp.einsum('ocyx,c->oy', w_conv, b_up, precision=hi).astype(jnp.float32)  # (C, 3)
    base = b_conv.astype(jnp.float32) + g.sum(-1)                                 # (C,)
    rows = jnp.broadcast_to(base[None, :, None], (2, C, H)).astype(jnp.float32)
    rows = rows.at[0, :, 0].add(-g[:, 0])
    rows = rows.at[1, :, H - 1].add(-g[:, 2])
    bias_map = jnp.broadcast_to(rows[:, None, :, :, None],
                                (2, 2, C, H, W)).reshape(4 * C, H * W)
    return w_big, bias_map


def upsample_block_forward(x, w_up, b_up, w_conv, b_conv):
    """Forward pass of UpSampleBlock.

    x:      (N, C, H, W)
    w_up:   (C, C, 2, 2)  PyTorch ConvTranspose2d weight (Cin, Cout, kH, kW)
    b_up:   (C,)
    w_conv: (C, C, 3, 3)  PyTorch Conv2d weight (Cout, Cin, kH, kW)
    b_conv: (C,)
    returns (N, C, 2H, 2W)
    """
    N, C, H, W = x.shape
    HW = H * W

    # Pad the SMALL input once: circular along W, zeros along H.  This reproduces the
    # post-upsample PeriodicPad2d(1) exactly for every tap the composed conv reads.
    xp = jnp.concatenate([x[..., -1:], x, x[..., :1]], axis=-1)           # (N, C, H, W+2)
    z = jnp.zeros((N, C, 1, W + 2), x.dtype)
    xp = jnp.concatenate([z, xp, z], axis=-2)                             # (N, C, H+2, W+2)

    # im2col of the small padded input: patch[n, (r*3+s)*C + c, i*W+u] = xp[n, c, i+r, u+s]
    wins = [xp[:, :, r:r + H, s:s + W] for r in range(3) for s in range(3)]
    patch = jnp.stack(wins, axis=1).reshape(N, 9 * C, HW)

    w_big, bias_map = _compose(w_up, b_up, w_conv, b_conv, H, W, x.dtype)

    flops = 2 * N * (4 * C) * (9 * C) * HW
    bytes_accessed = 4 * (N * 9 * C * HW + N * 4 * C * HW + 4 * C * 9 * C + 4 * C * HW)

    out_flat = pl.pallas_call(
        _upsample_block_kernel,
        out_shape=jax.ShapeDtypeStruct((N, 4 * C, HW), x.dtype),
        grid=(N,),
        in_specs=[
            pl.BlockSpec((1, 9 * C, HW), lambda n: (n, 0, 0)),
            pl.BlockSpec((4 * C, 9 * C), lambda n: (0, 0)),
            pl.BlockSpec((4 * C, HW), lambda n: (0, 0)),
        ],
        out_specs=pl.BlockSpec((1, 4 * C, HW), lambda n: (n, 0, 0)),
        compiler_params=pltpu.CompilerParams(dimension_semantics=("parallel",)),
        cost_estimate=pl.CostEstimate(flops=flops, transcendentals=0,
                                      bytes_accessed=bytes_accessed),
    )(patch, w_big, bias_map)

    # De-interleave parities: (n, p, q, o, i, u) -> (n, o, 2i+p, 2u+q).
    # TODO(synk): this small XLA transpose (32 KB here) could only be removed with a
    # strided/interleaved output layout, which BlockSpec cannot express.
    out = out_flat.reshape(N, 2, 2, C, H, W)
    out = jnp.transpose(out, (0, 3, 4, 1, 5, 2)).reshape(N, C, 2 * H, 2 * W)
    return out


def reference_forward(x, w_up, b_up, w_conv, b_conv):
    """Pure-JAX (NCHW) reference implementing the exact PyTorch semantics."""
    hi = jax.lax.Precision.HIGHEST
    N, C, H, W = x.shape
    # ConvTranspose2d k=2 s=2: out[n,o,2i+k,2j+l] = sum_c x[n,c,i,j] * W[c,o,k,l] + b[o]
    t = jnp.einsum('nchw,cokl->nohkwl', x, w_up, precision=hi)
    up = t.reshape(N, C, 2 * H, 2 * W) + b_up[None, :, None, None]
    # PeriodicPad2d(1): circular along W, zeros along H
    up = jnp.concatenate([up[..., -1:], up, up[..., :1]], axis=-1)
    z = jnp.zeros((N, C, 1, 2 * W + 2), x.dtype)
    p = jnp.concatenate([z, up, z], axis=-2)
    # Conv2d 3x3 valid
    out = jnp.zeros((N, C, 2 * H, 2 * W), x.dtype)
    for ky in range(3):
        for kx in range(3):
            out = out + jnp.einsum('nchw,oc->nohw',
                                   p[:, :, ky:ky + 2 * H, kx:kx + 2 * W],
                                   w_conv[:, :, ky, kx], precision=hi)
    return out + b_conv[None, :, None, None]


if __name__ == "__main__":
    key = jax.random.PRNGKey(0)
    k1, k2, k3, k4, k5 = jax.random.split(key, 5)
    N, C, H, W = 2, 4, 16, 16

    x = jax.random.normal(k1, (N, C, H, W), jnp.float32)
    w_up = jax.random.normal(k2, (C, C, 2, 2), jnp.float32) * 0.3
    b_up = jax.random.normal(k3, (C,), jnp.float32) * 0.1
    w_conv = jax.random.normal(k4, (C, C, 3, 3), jnp.float32) * 0.2
    b_conv = jax.random.normal(k5, (C,), jnp.float32) * 0.1

    out = jax.jit(upsample_block_forward)(x, w_up, b_up, w_conv, b_conv)
    out = jax.block_until_ready(out)

    ref = reference_forward(x, w_up, b_up, w_conv, b_conv)
    assert out.shape == (N, C, 2 * H, 2 * W), out.shape
    err = float(jnp.max(jnp.abs(out - ref)))
    assert jnp.allclose(out, ref, rtol=1e-4, atol=1e-4), err
    print("KERNEL_OK")
</pallas_src>

<mosaic_0001>
module attributes {stable_mosaic.version = 11 : i64} {
  func.func @_upsample_block_kernel(%arg0: i32, %arg1: memref<1x36x256xf32, #tpu.memory_space<vmem>>, %arg2: memref<16x36xf32, #tpu.memory_space<vmem>>, %arg3: memref<16x256xf32, #tpu.memory_space<vmem>>, %arg4: memref<1x16x256xf32, #tpu.memory_space<vmem>>) attributes {dimension_semantics = [#tpu.dimension_semantics<parallel>], iteration_bounds = array<i64: 2>, scalar_prefetch = 0 : i64, scratch_operands = 0 : i64, tpu.core_type = #tpu.core_type<tc>, window_params = [{transform_indices = @transform_0, window_bounds = array<i64: 1, 36, 256>}, {pipeline_mode = #tpu.pipeline_mode<synchronous>, transform_indices = @transform_1, window_bounds = array<i64: 16, 36>}, {pipeline_mode = #tpu.pipeline_mode<synchronous>, transform_indices = @transform_2, window_bounds = array<i64: 16, 256>}, {transform_indices = @transform_3, window_bounds = array<i64: 1, 16, 256>}]} {
    %c0 = arith.constant 0 : index
    %c0_0 = arith.constant 0 : index
    %0 = vector.load %arg2[%c0, %c0_0] : memref<16x36xf32, #tpu.memory_space<vmem>>, vector<16x36xf32>
    %c0_1 = arith.constant 0 : index
    %c0_2 = arith.constant 0 : index
    %c0_3 = arith.constant 0 : index
    %1 = vector.load %arg1[%c0_1, %c0_2, %c0_3] : memref<1x36x256xf32, #tpu.memory_space<vmem>>, vector<1x36x256xf32>
    %2 = vector.shape_cast %1 : vector<1x36x256xf32> to vector<36x256xf32>
    %cst = arith.constant dense<0.000000e+00> : vector<16x256xf32>
    %3 = tpu.matmul %0, %2, %cst {dimension_numbers = #tpu.dot_dimension_numbers<[1], [0], [0], [1], [0, 0, 1, 1], [], []>} : vector<16x36xf32>, vector<36x256xf32>, vector<16x256xf32> -> vector<16x256xf32>
    %c0_4 = arith.constant 0 : index
    %c0_5 = arith.constant 0 : index
    %4 = vector.load %arg3[%c0_4, %c0_5] : memref<16x256xf32, #tpu.memory_space<vmem>>, vector<16x256xf32>
    %5 = arith.addf %3, %4 : vector<16x256xf32>
    %c0_6 = arith.constant 0 : index
    %c0_7 = arith.constant 0 : index
    %c0_8 = arith.constant 0 : index
    %6 = vector.load %arg4[%c0_6, %c0_7, %c0_8] : memref<1x16x256xf32, #tpu.memory_space<vmem>>, vector<1x16x256xf32>
    %7 = vector.shape_cast %6 : vector<1x16x256xf32> to vector<16x256xf32>
    %8 = vector.shape_cast %5 : vector<16x256xf32> to vector<1x16x256xf32>
    tpu.vector_store %arg4[%c0_6, %c0_7, %c0_8], %8 {strides = array<i32>} : memref<1x16x256xf32, #tpu.memory_space<vmem>>, vector<1x16x256xf32>,
    return
  }
  func.func @transform_0(%arg0: i32) -> (i32, i32, i32) {
    %c0_i32 = arith.constant 0 : i32
    %c0_i32_0 = arith.constant 0 : i32
    %c0_i32_1 = arith.constant 0 : i32
    return %arg0, %c0_i32, %c0_i32_0 : i32, i32, i32
  }
  func.func @transform_1(%arg0: i32) -> (i32, i32) {
    %c0_i32 = arith.constant 0 : i32
    %c0_i32_0 = arith.constant 0 : i32
    %c0_i32_1 = arith.constant 0 : i32
    return %c0_i32, %c0_i32_0 : i32, i32
  }
  func.func @transform_2(%arg0: i32) -> (i32, i32) {
    %c0_i32 = arith.constant 0 : i32
    %c0_i32_0 = arith.constant 0 : i32
    %c0_i32_1 = arith.constant 0 : i32
    return %c0_i32, %c0_i32_0 : i32, i32
  }
  func.func @transform_3(%arg0: i32) -> (i32, i32, i32) {
    %c0_i32 = arith.constant 0 : i32
    %c0_i32_0 = arith.constant 0 : i32
    %c0_i32_1 = arith.constant 0 : i32
    return %arg0, %c0_i32, %c0_i32_0 : i32, i32, i32
  }
}

</mosaic_0001>

<bundles_post_ra>
// kernel: upsample_block_forward.1
= control target key start
LH: loop header
LB: loop body
LE: loop exit
PB: predicated region body
PF: predicated region fallthrough
CT: control target
= control target key end

     0   :  { %s370_s12 = smov 0   ;;  %s409_s0 = inlined_call_operand.vmem [shape: f32[2,36,256], index: 0, kind: input, shape index: {}]   ;;  %s410_s1 = inlined_call_operand.vmem [shape: f32[16,36], index: 1, kind: input, shape index: {}]   ;;  %s411_s2 = inlined_call_operand.vmem [shape: f32[16,256], index: 2, kind: input, shape index: {}]   ;;  %s412_s3 = inlined_call_operand.vmem [shape: f32[2,16,256], index: 3, kind: output, shape index: {}]  }
   0x1 LB: > { %s306_s13 = sadd.s32 4294967295, %s348_s12   ;;  %p310_p0 = scmp.ge.s32.totalorder %s348_s12, 1  ;;  %s348_s12 = sphi %s370_s12, %s13_s12  }
   0x2   : > { %p137_p1 = scmp.lt.s32.totalorder %s348_s12, 3 }
   0x4   : > { %p138_p2 = pnand %p310_p0, %p137_p1 }
   0x5   : > { %p161_p3 = scmp.lt.s32.totalorder (!%p138_p2), %s306_s13, 1 }
   0x6   : > { %141 = sbr.rel (%p138_p2) target bundleno = 161 (0xa1), region = 32 }
   0xb   : > { %s414_s13 = smov (!%p161_p3, %s306_s13), 1  ;;  %vm194_vm0 = vcmask 1043456   ;;  %v172_v10 = vld [vmem:[%s410_s1 + $0x8] sm:$0xff]  ;;  %vm187_vm1 = vcmask 293888   ;;  %v171_v11 = vld [vmem:[%s410_s1] sm:$0xff]  ;;  %v185_v18 = vld [vmem:[%s411_s2 + $0x10] sm:$0xff] }
   0xc   : > { %s333_s14 = smul.u32 80, %s414_s13  ;;  %s322_s22 = sshll.u32 %s414_s13, 5  ;;  %v183_v12 = vld [vmem:[%s411_s2] sm:$0xff]  ;;  %v184_v13 = vld [vmem:[%s411_s2 + $0x8] sm:$0xff]  ;;  %v186_v19 = vld [vmem:[%s411_s2 + $0x18] sm:$0xff] }
   0xd   : > { %s170_s29 = scalar_lea.vmem %s412_s3, %s322_s22 }
   0xe   : > { %s165_s17 = scalar_lea.vmem %s409_s0, %s333_s14 }
   0xf   : > { %v181_v0 = vld [vmem:[%s165_s17 + $0x40] sm:$0xf]  ;;  %v182_v1 = vld [vmem:[%s165_s17 + $0x48] sm:$0xf]  ;;  %v179_v2 = vld [vmem:[%s165_s17 + $0x30] sm:$0xff] }
  0x10   : > { %323 = vmatpush.msk.msra.mxu2 %vm194_vm0, %v181_v0  ;;  %328 = vmatpush.msk.msra.mxu3 %vm194_vm0, %v182_v1  ;;  %v180_v3 = vld [vmem:[%s165_s17 + $0x38] sm:$0xff]  ;;  %v177_v4 = vld [vmem:[%s165_s17 + $0x20] sm:$0xff]  ;;  %v178_v5 = vld [vmem:[%s165_s17 + $0x28] sm:$0xff] }
  0x11   : > { %314 = vmatpush.msk.msra.mxu0 %vm194_vm0, %v181_v0  ;;  %317 = vmatpush.msk.msra.mxu1 %vm194_vm0, %v182_v1  ;;  %v175_v6 = vld [vmem:[%s165_s17 + $0x10] sm:$0xff]  ;;  %v176_v7 = vld [vmem:[%s165_s17 + $0x18] sm:$0xff]  ;;  %v173_v8 = vld [vmem:[%s165_s17] sm:$0xff] }
  0x12   : > { %324 = vmatpush.msra.mxu2 %v179_v2  ;;  %329 = vmatpush.msra.mxu3 %v180_v3  ;;  %v174_v9 = vld [vmem:[%s165_s17 + $0x8] sm:$0xff] }
  0x13   : > { %213 = vmatpush.msra.mxu0 %v179_v2  ;;  %236 = vmatpush.msra.mxu1 %v180_v3 }
  0x14   : > { %325 = vmatpush.msra.mxu2 %v177_v4  ;;  %330 = vmatpush.msra.mxu3 %v178_v5 }
  0x15   : > { %214 = vmatpush.msra.mxu0 %v177_v4  ;;  %237 = vmatpush.msra.mxu1 %v178_v5 }
  0x16   : > { %326 = vmatpush.msra.mxu2 %v175_v6  ;;  %331 = vmatpush.msra.mxu3 %v176_v7 }
  0x17   : > { %215 = vmatpush.msra.mxu0 %v175_v6  ;;  %238 = vmatpush.msra.mxu1 %v176_v7 }
  0x18   : > { %327 = vmatpush.msra.mxu2 %v173_v8  ;;  %332 = vmatpush.msra.mxu3 %v174_v9 }
  0x19   : > { %316 = vmatmul.msk.f32.vlgmr.msra.gmra.mxu2 %vm187_vm1, %v172_v10  ;;  %319 = vmatmul.msk.f32.vlgmr.msra.gmra.mxu3 %vm187_vm1, %v172_v10 }
  0x1a   : > { %216 = vmatpush.msra.mxu0 %v173_v8  ;;  %239 = vmatpush.msra.mxu1 %v174_v9 }
  0x1b   : > { %315 = vmatmul.msk.f32.vlgmr.msra.gmra.mxu0 %vm187_vm1, %v171_v11  ;;  %318 = vmatmul.msk.f32.vlgmr.msra.gmra.mxu1 %vm187_vm1, %v171_v11 }
  0x98   : > { %v218_v14 = vpop.f32.mrf.mxu0  ;;  %v241_v15 = vpop.f32.mrf.mxu1 }
  0x99   : > { %v219_v16 = vadd.f32 %v218_v14, %v183_v12  ;;  %v242_v17 = vadd.f32 %v241_v15, %v184_v13 }
  0x9b   : > { %247 = vst [vmem:[%s170_s29] sm:$0xff] %v219_v16 }
  0x9c   : > { %v221_v20 = vpop.f32.mrf.mxu2  ;;  %248 = vst [vmem:[%s170_s29 + $0x8] sm:$0xff] %v242_v17  ;;  %v244_v21 = vpop.f32.mrf.mxu3 }
  0x9d   : > { %v222_v22 = vadd.f32 %v221_v20, %v185_v18  ;;  %v245_v23 = vadd.f32 %v244_v21, %v186_v19 }
  0x9f   : > { %249 = vst [vmem:[%s170_s29 + $0x10] sm:$0xff] %v222_v22 }
  0xa0   : > { %250 = vst [vmem:[%s170_s29 + $0x18] sm:$0xff] %v245_v23 }
  0xa1 PF: > { %s13_s12 = sadd.s32 1, %s348_s12  }
  0xa2   : > { %p10_p4 = scmp.ge.s32.totalorder %s13_s12, 4  }
  0xa4   :  { %12 = sbr.rel (!%p10_p4) target bundleno = 1 (0x1), region = 62 }

</bundles_post_ra>
